<compile_context>
chip_gen: v7x
topology: tpu7x:2x2x1
jax: 0.10.0
libtpu: 0.0.40
codegen_flags: <defaults>
</compile_context>

<pallas_src>
import jax
import jax.numpy as jnp
from jax.experimental import pallas as pl
from jax.experimental.pallas import tpu as pltpu


# ----------------------------------------------------------------------------
# Single fused Pallas kernel: both student stages (+ folded teachers) + ReLUs
# ----------------------------------------------------------------------------
def _student_fused_kernel(ps10_ref,                    # SMEM (1,) f32
                          x1_ref, hall2_ref,           # VMEM bf16 activations
                          w1c_ref, bias1_ref,          # stage-1 fused weight/bias
                          w2_ref, tw1f_ref, bias2_ref, # stage-2 weights/bias
                          out_ref):
    """Fused forward (teachers / Us already folded into the weights):

       h1  = relu( [ps00*obs | ps01*h_all] @ [W1; tw0_fold] + bias1 )
       out = relu( (ps10*h1) @ W2 + (ps11*h_all) @ tw1_fold + bias2 )

       bias1 = ps00*b1 + ps01*tb0_fold,  bias2 = ps10*b2 + ps11*tb1_fold
       (biases and the ps-scaled activations are prepared in the wrapper).
    """
    # ---- stage 1: one matmul, f32 accumulate, f32 epilogue ------------------
    h1 = jnp.dot(x1_ref[...], w1c_ref[...], preferred_element_type=jnp.float32)
    h1 = jnp.maximum(h1 + bias1_ref[...], 0.0)                      # (B, 512) f32

    # ---- stage 2: two matmuls (student + folded teacher), f32 epilogue ------
    h1b = (ps10_ref[0] * h1).astype(jnp.bfloat16)
    s2 = jnp.dot(h1b, w2_ref[...], preferred_element_type=jnp.float32)
    s2 = s2 + jnp.dot(hall2_ref[...], tw1f_ref[...],
                      preferred_element_type=jnp.float32)
    out_ref[...] = jnp.maximum(s2 + bias2_ref[...], 0.0).astype(out_ref.dtype)


def fused_forward_pallas(ps10, x1, hall2, w1c, bias1, w2, tw1f, bias2):
    B = x1.shape[0]
    H2 = w2.shape[1]
    vmem_spec = pl.BlockSpec(memory_space=pltpu.MemorySpace.VMEM)
    smem_spec = pl.BlockSpec(memory_space=pltpu.MemorySpace.SMEM)
    return pl.pallas_call(
        _student_fused_kernel,
        out_shape=jax.ShapeDtypeStruct((B, H2), jnp.float32),
        in_specs=[smem_spec] + [vmem_spec] * 7,
        out_specs=vmem_spec,
    )(ps10, x1, hall2, w1c, bias1, w2, tw1f, bias2)


# ----------------------------------------------------------------------------
# Deterministic parameter construction (synthetic; no checkpoint loading)
# ----------------------------------------------------------------------------
def init_params(key, C, T, E, K, H1=512, H2=256):
    input_dim = C * T
    enc_in_dim = C
    teach_in_dim = E * T

    def uniform(key, shape, bound):
        return jax.random.uniform(key, shape, jnp.float32, -bound, bound)

    ks = jax.random.split(key, 12)
    params = {}
    # encoder stand-in: Linear(C, E)
    params["enc_w"] = uniform(ks[0], (enc_in_dim, E), 1.0 / (enc_in_dim ** 0.5))
    params["enc_b"] = uniform(ks[1], (E,), 1.0 / (enc_in_dim ** 0.5))
    # teachers stand-in: K teachers, heads of size H1 and H2
    params["t_w0"] = uniform(ks[2], (K, teach_in_dim, H1), 1.0 / (teach_in_dim ** 0.5))
    params["t_b0"] = uniform(ks[3], (K, H1), 1.0 / (teach_in_dim ** 0.5))
    params["t_w1"] = uniform(ks[4], (K, teach_in_dim, H2), 1.0 / (teach_in_dim ** 0.5))
    params["t_b1"] = uniform(ks[5], (K, H2), 1.0 / (teach_in_dim ** 0.5))
    # student MLP: Linear(input_dim, 512) -> ReLU -> Linear(512, 256) -> ReLU
    params["w1"] = uniform(ks[6], (input_dim, H1), 1.0 / (input_dim ** 0.5))
    params["b1"] = uniform(ks[7], (H1,), 1.0 / (input_dim ** 0.5))
    params["w2"] = uniform(ks[8], (H1, H2), 1.0 / (H1 ** 0.5))
    params["b2"] = uniform(ks[9], (H2,), 1.0 / (H1 ** 0.5))
    # Us_1 / Us_2: xavier_uniform
    xb1 = (6.0 / (H1 + H1)) ** 0.5
    xb2 = (6.0 / (H2 + H2)) ** 0.5
    params["Us_1"] = jax.random.uniform(ks[10], (H1, H1), jnp.float32, -xb1, xb1)
    params["Us_2"] = jax.random.uniform(ks[11], (H2, H2), jnp.float32, -xb2, xb2)
    # mixing scalars (nn.Parameter 0.4725 in the reference)
    params["ps00"] = jnp.asarray(0.4725, jnp.float32)
    params["ps10"] = jnp.asarray(0.4725, jnp.float32)
    return params


def prepare_params(params):
    """Host-side algebraic folding + bf16 cast of the big weights.

    All folds are done in f32 and are exact w.r.t. the f32 reference math:
      * sum over K teachers (downstream math only ever uses sum_k zs[k])
      * Us_1 / Us_2 folded into the summed teacher weights/biases
      * W1 and tw0_fold stacked so stage 1 is a single matmul.
    """
    bf = jnp.bfloat16
    tw0_sum = jnp.sum(params["t_w0"], axis=0)            # (TE, 512) f32
    tb0_sum = jnp.sum(params["t_b0"], axis=0)            # (512,)    f32
    tw1_sum = jnp.sum(params["t_w1"], axis=0)            # (TE, 256) f32
    tb1_sum = jnp.sum(params["t_b1"], axis=0)            # (256,)    f32

    tw0_fold = tw0_sum @ params["Us_1"]                  # (TE, 512) f32
    tb0_fold = tb0_sum @ params["Us_1"]                  # (512,)    f32
    tw1_fold = tw1_sum @ params["Us_2"]                  # (TE, 256) f32
    tb1_fold = tb1_sum @ params["Us_2"]                  # (256,)    f32

    p = {
        "enc_w": params["enc_w"],
        "enc_b": params["enc_b"],
        # stage-1 fused weight: [W1; tw0_fold] over the contraction dim
        "w1_cat": jnp.concatenate([params["w1"], tw0_fold], axis=0).astype(bf),
        "b1": params["b1"].reshape(1, -1),
        "tb0_fold": tb0_fold.reshape(1, -1),
        # stage-2 weights
        "w2": params["w2"].astype(bf),
        "b2": params["b2"].reshape(1, -1),
        "tw1_fold": tw1_fold.astype(bf),
        "tb1_fold": tb1_fold.reshape(1, -1),
        # mixing scalars
        "ps00": params["ps00"],
        "ps10": params["ps10"],
    }
    return p


# ----------------------------------------------------------------------------
# Forward pass (act=None path of student_mlp.forward)
# ----------------------------------------------------------------------------
@jax.jit
def student_mlp_forward(p, obs):
    """obs: [B, C, T] float32 (PyTorch layout).
    Returns (out[B,256], student_ps[1], embedding[B,E])."""
    B, C, T = obs.shape
    obs_flat = obs.reshape(B, C * T)

    # --- encoder applied per time step, concatenated along features ---------
    # Tiny (C=4-lane) matmul: plain-JAX einsum; too small to justify a kernel.
    emb = jax.nn.relu(jnp.einsum("bct,ce->bte", obs, p["enc_w"]) + p["enc_b"])
    E = emb.shape[-1]
    h_all = emb.reshape(B, T * E)          # concat over t along dim=1
    embedding = emb[:, T - 1, :]           # last-iteration embedding (as in the torch loop)

    # TODO(synk): `act is not None` branch (concat action into obs / embedding) not implemented;
    # only the act=None path of forward() is reproduced here.

    # --- mixing scalars (the .item() >= 0.95 parameter reset is a no-op at 0.4725) ---
    ps00_c = jnp.clip(p["ps00"], 0.0, 1.0)
    ps01_c = jnp.clip(1.0 - p["ps00"], 0.0, 1.0)
    ps10_c = jnp.clip(p["ps10"], 0.0, 1.0)
    ps11_c = jnp.clip(1.0 - p["ps10"], 0.0, 1.0)

    # --- ps-scaled activations / fused biases (f32 math, then bf16 for DMA) ---
    x1 = jnp.concatenate([ps00_c * obs_flat, ps01_c * h_all],
                         axis=1).astype(jnp.bfloat16)          # (B, Din + T*E)
    hall2 = (ps11_c * h_all).astype(jnp.bfloat16)              # (B, T*E)
    bias1 = ps00_c * p["b1"] + ps01_c * p["tb0_fold"]          # (1, 512) f32
    bias2 = ps10_c * p["b2"] + ps11_c * p["tb1_fold"]          # (1, 256) f32
    ps10_arr = ps10_c.reshape(1).astype(jnp.float32)           # SMEM scalar

    # --- single fused Pallas kernel: both stages + folded teachers + ReLUs ---
    out = fused_forward_pallas(ps10_arr, x1, hall2,
                               p["w1_cat"], bias1,
                               p["w2"], p["tw1_fold"], bias2)

    student_ps = ((ps00_c + ps10_c) / 2.0).reshape(1)
    return out, student_ps, embedding


# ----------------------------------------------------------------------------
# Pure-JAX f32 reference (mirrors the PyTorch forward, no folding)
# ----------------------------------------------------------------------------
def reference_forward(params, obs):
    B, C, T = obs.shape
    obs_flat = obs.reshape(B, C * T)
    emb = jax.nn.relu(jnp.einsum("bct,ce->bte", obs, params["enc_w"]) + params["enc_b"])
    h_all = emb.reshape(B, -1)
    embedding = emb[:, T - 1, :]

    zs0 = jnp.einsum("bi,kio->kbo", h_all, params["t_w0"]) + params["t_b0"][:, None, :]
    zs1 = jnp.einsum("bi,kio->kbo", h_all, params["t_w1"]) + params["t_b1"][:, None, :]

    ps00_c = jnp.clip(params["ps00"], 0.0, 1.0)
    ps01_c = jnp.clip(1.0 - params["ps00"], 0.0, 1.0)
    ps10_c = jnp.clip(params["ps10"], 0.0, 1.0)
    ps11_c = jnp.clip(1.0 - params["ps10"], 0.0, 1.0)

    student1 = obs_flat @ params["w1"] + params["b1"]
    teacher_sum1 = jnp.sum(jnp.matmul(ps01_c * zs0, params["Us_1"]), axis=0)
    h1 = jax.nn.relu(teacher_sum1 + ps00_c * student1)

    student2 = h1 @ params["w2"] + params["b2"]
    teacher_sum2 = jnp.sum(jnp.matmul(ps11_c * zs1, params["Us_2"]), axis=0)
    out = jax.nn.relu(teacher_sum2 + ps10_c * student2)

    student_ps = ((ps00_c + ps10_c) / 2.0).reshape(1)
    return out, student_ps, embedding


if __name__ == "__main__":
    # Small shapes consistent with the module: env_state_shape = (C, T) = (4, 8)
    # -> input_dim = 32; hidden sizes fixed by Us_1/Us_2 at [512, 256];
    # encoder embedding E = 16 so T*E = 128 (lane-dense teacher input).
    B, C, T, E, K = 2, 4, 8, 16, 2

    key = jax.random.PRNGKey(0)
    pkey, xkey = jax.random.split(key)
    params = init_params(pkey, C=C, T=T, E=E, K=K)
    prepared = prepare_params(params)
    obs = jax.random.normal(xkey, (B, C, T), dtype=jnp.float32)

    out, student_ps, embedding = student_mlp_forward(prepared, obs)
    jax.block_until_ready((out, student_ps, embedding))

    assert out.shape == (B, 256) and out.dtype == jnp.float32
    assert student_ps.shape == (1,)
    assert embedding.shape == (B, E)
    assert bool(jnp.all(jnp.isfinite(out)))

    # Loose check vs. the unfolded f32 reference (bf16 weights -> ~0.5% drift).
    ref_out, ref_ps, ref_emb = reference_forward(params, obs)
    assert bool(jnp.allclose(out, ref_out, rtol=5e-2, atol=5e-2))
    assert bool(jnp.allclose(student_ps, ref_ps, rtol=1e-5, atol=1e-5))
    assert bool(jnp.allclose(embedding, ref_emb, rtol=1e-5, atol=1e-5))

    print("KERNEL_OK")
</pallas_src>

<mosaic_0001>
module attributes {stable_mosaic.version = 11 : i64} {
  func.func @_student_fused_kernel(%arg0: memref<1xf32, #tpu.memory_space<smem>>, %arg1: memref<2x160xbf16, #tpu.memory_space<vmem>>, %arg2: memref<2x128xbf16, #tpu.memory_space<vmem>>, %arg3: memref<160x512xbf16, #tpu.memory_space<vmem>>, %arg4: memref<1x512xf32, #tpu.memory_space<vmem>>, %arg5: memref<512x256xbf16, #tpu.memory_space<vmem>>, %arg6: memref<128x256xbf16, #tpu.memory_space<vmem>>, %arg7: memref<1x256xf32, #tpu.memory_space<vmem>>, %arg8: memref<2x256xf32, #tpu.memory_space<vmem>>) attributes {dimension_semantics = [], scalar_prefetch = 0 : i64, scratch_operands = 0 : i64, tpu.core_type = #tpu.core_type<tc>} {
    %c0 = arith.constant 0 : index
    %c0_0 = arith.constant 0 : index
    %0 = vector.load %arg1[%c0, %c0_0] : memref<2x160xbf16, #tpu.memory_space<vmem>>, vector<2x160xbf16>
    %c0_1 = arith.constant 0 : index
    %c0_2 = arith.constant 0 : index
    %1 = vector.load %arg3[%c0_1, %c0_2] : memref<160x512xbf16, #tpu.memory_space<vmem>>, vector<160x512xbf16>
    %cst = arith.constant dense<0.000000e+00> : vector<2x512xf32>
    %2 = tpu.matmul %0, %1, %cst {dimension_numbers = #tpu.dot_dimension_numbers<[1], [0], [0], [1], [0, 0, 1, 1], [], []>} : vector<2x160xbf16>, vector<160x512xbf16>, vector<2x512xf32> -> vector<2x512xf32>
    %c0_3 = arith.constant 0 : index
    %c0_4 = arith.constant 0 : index
    %3 = vector.load %arg4[%c0_3, %c0_4] : memref<1x512xf32, #tpu.memory_space<vmem>>, vector<1x512xf32>
    %4 = vector.broadcast %3 : vector<1x512xf32> to vector<2x512xf32>
    %5 = arith.addf %2, %4 : vector<2x512xf32>
    %cst_5 = arith.constant 0.000000e+00 : f32
    %6 = vector.broadcast %cst_5 : f32 to vector<2x512xf32>
    %7 = arith.maximumf %5, %6 : vector<2x512xf32>
    %c0_6 = arith.constant 0 : index
    %8 = memref.load %arg0[%c0_6] : memref<1xf32, #tpu.memory_space<smem>>
    %9 = vector.broadcast %8 : f32 to vector<2x512xf32>
    %10 = arith.mulf %9, %7 : vector<2x512xf32>
    %11 = arith.truncf %10 : vector<2x512xf32> to vector<2x512xbf16>
    %c0_7 = arith.constant 0 : index
    %c0_8 = arith.constant 0 : index
    %12 = vector.load %arg5[%c0_7, %c0_8] : memref<512x256xbf16, #tpu.memory_space<vmem>>, vector<512x256xbf16>
    %cst_9 = arith.constant dense<0.000000e+00> : vector<2x256xf32>
    %13 = tpu.matmul %11, %12, %cst_9 {dimension_numbers = #tpu.dot_dimension_numbers<[1], [0], [0], [1], [0, 0, 1, 1], [], []>} : vector<2x512xbf16>, vector<512x256xbf16>, vector<2x256xf32> -> vector<2x256xf32>
    %c0_10 = arith.constant 0 : index
    %c0_11 = arith.constant 0 : index
    %14 = vector.load %arg2[%c0_10, %c0_11] : memref<2x128xbf16, #tpu.memory_space<vmem>>, vector<2x128xbf16>
    %c0_12 = arith.constant 0 : index
    %c0_13 = arith.constant 0 : index
    %15 = vector.load %arg6[%c0_12, %c0_13] : memref<128x256xbf16, #tpu.memory_space<vmem>>, vector<128x256xbf16>
    %cst_14 = arith.constant dense<0.000000e+00> : vector<2x256xf32>
    %16 = tpu.matmul %14, %15, %cst_14 {dimension_numbers = #tpu.dot_dimension_numbers<[1], [0], [0], [1], [0, 0, 1, 1], [], []>} : vector<2x128xbf16>, vector<128x256xbf16>, vector<2x256xf32> -> vector<2x256xf32>
    %17 = arith.addf %13, %16 : vector<2x256xf32>
    %c0_15 = arith.constant 0 : index
    %c0_16 = arith.constant 0 : index
    %18 = vector.load %arg7[%c0_15, %c0_16] : memref<1x256xf32, #tpu.memory_space<vmem>>, vector<1x256xf32>
    %19 = vector.broadcast %18 : vector<1x256xf32> to vector<2x256xf32>
    %20 = arith.addf %17, %19 : vector<2x256xf32>
    %cst_17 = arith.constant 0.000000e+00 : f32
    %21 = vector.broadcast %cst_17 : f32 to vector<2x256xf32>
    %22 = arith.maximumf %20, %21 : vector<2x256xf32>
    %c0_18 = arith.constant 0 : index
    %c0_19 = arith.constant 0 : index
    %23 = vector.load %arg8[%c0_18, %c0_19] : memref<2x256xf32, #tpu.memory_space<vmem>>, vector<2x256xf32>
    tpu.vector_store %arg8[%c0_18, %c0_19], %22 {strides = array<i32>} : memref<2x256xf32, #tpu.memory_space<vmem>>, vector<2x256xf32>,
    return
  }
}

</mosaic_0001>

<bundles_post_ra>
// kernel: student_mlp_forward.1
= control target key start
LH: loop header
LB: loop body
LE: loop exit
PB: predicated region body
PF: predicated region fallthrough
CT: control target
= control target key end

     0   :  { %14 = vsyncpa [#allocation4], 0  ;;  %s1640_s0 = inlined_call_operand.<no memory space> [shape: f32[1], index: 0, kind: input, shape index: {}]   ;;  %s1641_s1 = inlined_call_operand.vmem [shape: bf16[2,160], index: 1, kind: input, shape index: {}]   ;;  %s1642_s2 = inlined_call_operand.vmem [shape: bf16[2,128], index: 2, kind: input, shape index: {}]   ;;  %s1643_s3 = inlined_call_operand.hbm [shape: bf16[160,512], index: 3, kind: input, shape index: {}]   ;;  %s1644_s4 = inlined_call_operand.vmem [shape: f32[1,512], index: 4, kind: input, shape index: {}]   ;;  %s1645_s5 = inlined_call_operand.hbm [shape: bf16[512,256], index: 5, kind: input, shape index: {}]   ;;  %s1646_s6 = inlined_call_operand.vmem [shape: bf16[128,256], index: 6, kind: input, shape index: {}]   ;;  %s1647_s7 = inlined_call_operand.vmem [shape: f32[1,256], index: 7, kind: input, shape index: {}]   ;;  %s1648_s8 = inlined_call_operand.hbm [shape: f32[2,256], index: 8, kind: output, shape index: {}]  }
   0x1   :  { %15 = vsyncpa [#allocation7], 0 }
   0x2   :  { %16 = vsyncpa [#allocation5], 0  ;;  %s1480_s27 = smov [#allocation3]   ;;  %s1408_s9 = scalar_lea.hbm %s1643_s3, 5120 }
   0x3   :  { %s28_s28 = sshll.u32 %s1480_s27, 4  ;;  %p1409_p0 = scmp.ne.s32.totalorder %s1643_s3, %s1408_s9  ;;  %s29_s28 = int_to_ptr.vmem [resolvable:$true] %s28_s28 }
   0x4   :  { %p1412_p1 = scmp.lt.u32.totalorder %s1408_s9, %s1643_s3 }
   0x6   :  { %p1414_p2 = pnand %p1412_p1, %p1409_p0 }
   0x8   :  { %1417 = shalt.err (!%p1414_p2)
}
   0x9   :  { %s1418_s14 = scalar_lea.vmem %s29_s28, 5120  ;;  %p1423_p4 = scmp.lt.s32.totalorder %s29_s28, %s29_s28 }
   0xa   :  { %p1419_p3 = scmp.ne.s32.totalorder %s29_s28, %s1418_s14  ;;  %p1424_p5 = scmp.lt.s32.totalorder %s1418_s14, %s1418_s14 }
   0xc   :  { %p1425_p6 = por %p1424_p5, %p1423_p4 }
   0xe   :  { %p1426_p7 = pnand %p1425_p6, %p1419_p3 }
  0x10   :  { %1429 = shalt.err (!%p1426_p7)
}
  0x11   :  { %s1481_s15 = smov 256   ;;  %s1482_s16 = smov 16  }
  0x12   :  { %34 = dma.hbm_to_vmem [thread:$0]  %s1643_s3, 5120, %s29_s28, [#allocation4], %s1481_s15, %s1481_s15, %s1482_s16  }
  0x13   :  { %s1483_s19 = smov [#allocation6]   ;;  %s1430_s23 = scalar_lea.hbm %s1645_s5, 8192 }
  0x14   :  { %s42_s20 = sshll.u32 %s1483_s19, 4  ;;  %p1431_p8 = scmp.ne.s32.totalorder %s1645_s5, %s1430_s23  ;;  %s43_s20 = int_to_ptr.vmem [resolvable:$true] %s42_s20 }
  0x15   :  { %p1434_p9 = scmp.lt.u32.totalorder %s1430_s23, %s1645_s5 }
  0x17   :  { %p1436_p10 = pnand %p1434_p9, %p1431_p8 }
  0x19   :  { %1439 = shalt.err (!%p1436_p10)
}
  0x1a   :  { %s1440_s29 = scalar_lea.vmem %s43_s20, 8192  ;;  %p1445_p12 = scmp.lt.s32.totalorder %s43_s20, %s43_s20 }
  0x1b   :  { %p1441_p11 = scmp.ne.s32.totalorder %s43_s20, %s1440_s29  ;;  %p1446_p13 = scmp.lt.s32.totalorder %s1440_s29, %s1440_s29 }
  0x1d   :  { %p1447_p0 = por %p1446_p13, %p1445_p12 }
  0x1f   :  { %p1448_p1 = pnand %p1447_p0, %p1441_p11 }
  0x21   :  { %1451 = shalt.err (!%p1448_p1)
}
  0x22   :  { %s1484_s3 = smov 128   ;;  %s1485_s28 = smov 8  }
  0x23   :  { %48 = dma.hbm_to_vmem [thread:$0]  %s1645_s5, 8192, %s43_s20, [#allocation7], %s1484_s3, %s1484_s3, %s1485_s28  }
  0x24   :  { %1474 = dma.done.wait [#allocation4], 5120  }
  0x25   :  { %1475 = vsyncadd [#allocation4], 4294962176 }
  0x26   :  { %1476 = dma.done.wait [#allocation7], 8192  }
  0x27   :  { %1477 = vsyncadd [#allocation7], 4294959104  ;;  %v1228_v0 = vld [vmem:[#allocation3 + $0x4] ss:$16 sps:$4 sm:$0xff]   ;;  %v1230_v1 = vld [vmem:[#allocation3 + $0xc] ss:$16 sps:$4 sm:$0xff]   ;;  %v103_v22 = vlaneseq }
  0x28   :  { %351 = vmatprep.subr.bf16.mxu0 %v1228_v0  ;;  %v1232_v2 = vld [vmem:[#allocation3] ss:$16 sps:$4 sm:$0xff]   ;;  %v1233_v3 = vld [vmem:[#allocation3 + $0x8] ss:$16 sps:$4 sm:$0xff]   ;;  %392 = vmatprep.subr.bf16.mxu1 %v1230_v1  ;;  %v1234_v4 = vld [vmem:[#allocation3 + $0x24] ss:$16 sps:$4 sm:$0xff]  }
  0x29   :  { %352 = vmatpush1.bf16.msra.mxu0 %v1232_v2  ;;  %393 = vmatpush1.bf16.msra.mxu1 %v1233_v3  ;;  %v1236_v5 = vld [vmem:[#allocation3 + $0x2c] ss:$16 sps:$4 sm:$0xff]   ;;  %v1238_v6 = vld [vmem:[#allocation3 + $0x20] ss:$16 sps:$4 sm:$0xff]   ;;  %v1239_v7 = vld [vmem:[#allocation3 + $0x28] ss:$16 sps:$4 sm:$0xff]  }
  0x2a   :  { %353 = vmatprep.subr.bf16.mxu0 %v1234_v4  ;;  %394 = vmatprep.subr.bf16.mxu1 %v1236_v5  ;;  %v1240_v8 = vld [vmem:[#allocation3 + $0x44] ss:$16 sps:$4 sm:$0xff]   ;;  %v1242_v9 = vld [vmem:[#allocation3 + $0x4c] ss:$16 sps:$4 sm:$0xff]   ;;  %v1244_v10 = vld [vmem:[#allocation3 + $0x40] ss:$16 sps:$4 sm:$0xff]  }
  0x2b   :  { %v1245_v11 = vld [vmem:[#allocation3 + $0x48] ss:$16 sps:$4 sm:$0xff]   ;;  %v1246_v12 = vld [vmem:[#allocation3 + $0x64] ss:$16 sps:$4 sm:$0xff]   ;;  %v1248_v13 = vld [vmem:[#allocation3 + $0x6c] ss:$16 sps:$4 sm:$0xff]  }
  0x2c   :  { %v1250_v14 = vld [vmem:[#allocation3 + $0x60] ss:$16 sps:$4 sm:$0xff]   ;;  %v1251_v15 = vld [vmem:[#allocation3 + $0x68] ss:$16 sps:$4 sm:$0xff]   ;;  %v1252_v16 = vld [vmem:[#allocation3 + $0x84] ss:$16 sps:$4 sm:$0xff]  }
  0x2d   :  { %354 = vmatpush1.bf16.msra.mxu0 %v1238_v6  ;;  %395 = vmatpush1.bf16.msra.mxu1 %v1239_v7  ;;  %v1254_v17 = vld [vmem:[#allocation3 + $0x8c] ss:$16 sps:$4 sm:$0xff]   ;;  %v1256_v18 = vld [vmem:[#allocation3 + $0x80] ss:$16 sps:$4 sm:$0xff]   ;;  %v1257_v19 = vld [vmem:[#allocation3 + $0x88] ss:$16 sps:$4 sm:$0xff]  }
  0x2e   :  { %355 = vmatprep.subr.bf16.mxu0 %v1240_v8  ;;  %396 = vmatprep.subr.bf16.mxu1 %v1242_v9  ;;  %v1258_v20 = vld [vmem:[#allocation3 + $0xa4] ss:$16 sps:$4 sm:$0xff]   ;;  %v1260_v21 = vld [vmem:[#allocation3 + $0xac] ss:$16 sps:$4 sm:$0xff]   ;;  %v1486_v23 = vmov 1966171168  }
  0x2f   :  { %v133_v24 = vunpack.c.l.s4 %v1486_v23  ;;  %v1262_v25 = vld [vmem:[#allocation3 + $0xa0] ss:$16 sps:$4 sm:$0xff]   ;;  %v1263_v26 = vld [vmem:[#allocation3 + $0xa8] ss:$16 sps:$4 sm:$0xff]   ;;  %v1264_v27 = vld [vmem:[#allocation3 + $0xc4] ss:$16 sps:$4 sm:$0xff]  }
  0x30   :  { %v1266_v28 = vld [vmem:[#allocation3 + $0xcc] ss:$16 sps:$4 sm:$0xff]   ;;  %v1558_v29 = vshrl.u32 %v103_v22, 7  ;;  %v1268_v31 = vld [vmem:[#allocation3 + $0xc0] ss:$16 sps:$4 sm:$0xff]   ;;  %vm347_vm0 = vcmask 261120  }
  0x31   :  { %356 = vmatpush1.bf16.msra.mxu0 %v1244_v10  ;;  %397 = vmatpush1.bf16.msra.mxu1 %v1245_v11  ;;  %v134_v30 = vunpack.c.0.s8 %v133_v24  ;;  %v1269_v32 = vld [vmem:[#allocation3 + $0xc8] ss:$16 sps:$4 sm:$0xff]   ;;  %v1270_v33 = vld [vmem:[#allocation3 + $0xe4] ss:$16 sps:$4 sm:$0xff]   ;;  %v1272_v34 = vld [vmem:[#allocation3 + $0xec] ss:$16 sps:$4 sm:$0xff]  }
  0x32   :  { %357 = vmatprep.subr.bf16.mxu0 %v1246_v12  ;;  %398 = vmatprep.subr.bf16.mxu1 %v1248_v13  ;;  %v1095_v36 = vld.sshfl [vmem:[%s1641_s1] sm:$0x11 pattern:$0x75316420]  ;;  %v1275_v38 = vld [vmem:[#allocation3 + $0xe8] ss:$16 sps:$4 sm:$0xff]  }
  0x33   :  { %v137_v35 = vsub.s32 %v134_v30, %v1558_v29  ;;  %v1274_v37 = vld [vmem:[#allocation3 + $0xe0] ss:$16 sps:$4 sm:$0xff]   ;;  %v131_v39 = vcombine.high %v1095_v36, %v1095_v36  ;;  %v1276_v40 = vld [vmem:[#allocation3 + $0x104] ss:$16 sps:$4 sm:$0xff]   ;;  %v1278_v41 = vld [vmem:[#allocation3 + $0x10c] ss:$16 sps:$4 sm:$0xff]  }
  0x34   :  { %v1280_v43 = vld [vmem:[#allocation3 + $0x100] ss:$16 sps:$4 sm:$0xff]   ;;  %v1281_v44 = vld [vmem:[#allocation3 + $0x108] ss:$16 sps:$4 sm:$0xff]   ;;  %v1282_v45 = vld [vmem:[#allocation3 + $0x124] ss:$16 sps:$4 sm:$0xff]  }
  0x35   :  { %358 = vmatpush1.bf16.msra.mxu0 %v1250_v14  ;;  %399 = vmatpush1.bf16.msra.mxu1 %v1251_v15  ;;  %v145_v42 = vrot.slane %v131_v39, %v137_v35  ;;  %v1284_v46 = vld [vmem:[#allocation3 + $0x12c] ss:$16 sps:$4 sm:$0xff]   ;;  %v1286_v47 = vld [vmem:[#allocation3 + $0x120] ss:$16 sps:$4 sm:$0xff]   ;;  %v1287_v48 = vld [vmem:[#allocation3 + $0x128] ss:$16 sps:$4 sm:$0xff]   ;;  %v138_v50 = vrot.slane %v1095_v36, %v137_v35 }
  0x36   :  { %359 = vmatprep.subr.bf16.mxu0 %v1252_v16  ;;  %400 = vmatprep.subr.bf16.mxu1 %v1254_v17  ;;  %v1290_v49 = vld [vmem:[%s1646_s6 + $0x4] ss:$8 sps:$4 sm:$0xff]   ;;  %v1288_v52 = vld [vmem:[%s1646_s6] ss:$8 sps:$4 sm:$0xff]   ;;  %v1293_v53 = vld [vmem:[%s1646_s6 + $0x14] ss:$8 sps:$4 sm:$0xff]  }
  0x37   :  { %1136 = vmatprep.mubr.msk.bf16.mxu0 %vm347_vm0, %v145_v42  ;;  %1137 = vmatprep.mubr.msk.bf16.mxu1 %vm347_vm0, %v145_v42  ;;  %v1314_v51 = vld [vmem:[#allocation6 + $0x4] ss:$8 sps:$4 sm:$0xff]   ;;  %v1312_v54 = vld [vmem:[#allocation6] ss:$8 sps:$4 sm:$0xff]   ;;  %v1320_v55 = vld [vmem:[#allocation6 + $0x14] ss:$8 sps:$4 sm:$0xff]  }
  0x38   :  { %v1291_v56 = vld [vmem:[%s1646_s6 + $0x10] ss:$8 sps:$4 sm:$0xff]   ;;  %v1487_v57 = vmov 0   ;;  %v1296_v58 = vld [vmem:[%s1646_s6 + $0x24] ss:$8 sps:$4 sm:$0xff]   ;;  %s1488_s21 = smov [#allocation8]  }
  0x39   :  { %360 = vmatpush1.bf16.msra.mxu0 %v1256_v18  ;;  %401 = vmatpush1.bf16.msra.mxu1 %v1257_v19  ;;  %v1318_v59 = vld [vmem:[#allocation6 + $0x10] ss:$8 sps:$4 sm:$0xff]   ;;  %v1326_v60 = vld [vmem:[#allocation6 + $0x24] ss:$8 sps:$4 sm:$0xff]   ;;  %v1294_v61 = vld [vmem:[%s1646_s6 + $0x20] ss:$8 sps:$4 sm:$0xff]  }
  0x3a   :  { %361 = vmatprep.subr.bf16.mxu0 %v1258_v20  ;;  %402 = vmatprep.subr.bf16.mxu1 %v1260_v21  ;;  %v1299_v62 = vld [vmem:[%s1646_s6 + $0x34] ss:$8 sps:$4 sm:$0xff]   ;;  %v1324_v63 = vld [vmem:[#allocation6 + $0x20] ss:$8 sps:$4 sm:$0xff]   ;;  %v1297_v1 = vld [vmem:[%s1646_s6 + $0x30] ss:$8 sps:$4 sm:$0xff]  }
  0x3b   :  { %v1332_v0 = vld [vmem:[#allocation6 + $0x34] ss:$8 sps:$4 sm:$0xff]   ;;  %v1302_v2 = vld [vmem:[%s1646_s6 + $0x44] ss:$8 sps:$4 sm:$0xff]   ;;  %v1330_v3 = vld [vmem:[#allocation6 + $0x30] ss:$8 sps:$4 sm:$0xff]  }
  0x3c   :  { %v1338_v4 = vld [vmem:[#allocation6 + $0x44] ss:$8 sps:$4 sm:$0xff]   ;;  %v1300_v5 = vld [vmem:[%s1646_s6 + $0x40] ss:$8 sps:$4 sm:$0xff]   ;;  %v1305_v6 = vld [vmem:[%s1646_s6 + $0x54] ss:$8 sps:$4 sm:$0xff]  }
  0x3d   :  { %362 = vmatpush1.bf16.msra.mxu0 %v1262_v25  ;;  %403 = vmatpush1.bf16.msra.mxu1 %v1263_v26  ;;  %v1336_v7 = vld [vmem:[#allocation6 + $0x40] ss:$8 sps:$4 sm:$0xff]   ;;  %v1344_v8 = vld [vmem:[#allocation6 + $0x54] ss:$8 sps:$4 sm:$0xff]   ;;  %v1303_v9 = vld [vmem:[%s1646_s6 + $0x50] ss:$8 sps:$4 sm:$0xff]  }
  0x3e   :  { %363 = vmatprep.subr.bf16.mxu0 %v1264_v27  ;;  %404 = vmatprep.subr.bf16.mxu1 %v1266_v28  ;;  %v1308_v10 = vld [vmem:[%s1646_s6 + $0x64] ss:$8 sps:$4 sm:$0xff]   ;;  %v1342_v11 = vld [vmem:[#allocation6 + $0x50] ss:$8 sps:$4 sm:$0xff]   ;;  %v1306_v13 = vld [vmem:[%s1646_s6 + $0x60] ss:$8 sps:$4 sm:$0xff]  }
  0x3f   :  { %v1350_v12 = vld [vmem:[#allocation6 + $0x64] ss:$8 sps:$4 sm:$0xff]   ;;  %v1311_v14 = vld [vmem:[%s1646_s6 + $0x74] ss:$8 sps:$4 sm:$0xff]   ;;  %v1348_v15 = vld [vmem:[#allocation6 + $0x60] ss:$8 sps:$4 sm:$0xff]  }
  0x40   :  { %v1356_v16 = vld [vmem:[#allocation6 + $0x74] ss:$8 sps:$4 sm:$0xff]   ;;  %v1309_v17 = vld [vmem:[%s1646_s6 + $0x70] ss:$8 sps:$4 sm:$0xff]   ;;  %v1317_v18 = vld [vmem:[#allocation6 + $0x104] ss:$8 sps:$4 sm:$0xff]  }
  0x41   :  { %364 = vmatpush1.bf16.msra.mxu0 %v1268_v31  ;;  %405 = vmatpush1.bf16.msra.mxu1 %v1269_v32  ;;  %v1354_v19 = vld [vmem:[#allocation6 + $0x70] ss:$8 sps:$4 sm:$0xff]   ;;  %v1362_v20 = vld [vmem:[#allocation6 + $0x84] ss:$8 sps:$4 sm:$0xff]   ;;  %v511_v21 = vld [vmem:[%s1642_s2] sm:$0x1] }
  0x42   :  { %365 = vmatprep.subr.bf16.mxu0 %v1270_v33  ;;  %406 = vmatprep.subr.bf16.mxu1 %v1272_v34  ;;  %v1315_v22 = vld [vmem:[#allocation6 + $0x100] ss:$8 sps:$4 sm:$0xff]   ;;  %v1323_v23 = vld [vmem:[#allocation6 + $0x114] ss:$8 sps:$4 sm:$0xff]   ;;  %v1321_v25 = vld [vmem:[#allocation6 + $0x110] ss:$8 sps:$4 sm:$0xff]  }
  0x43   :  { %v1360_v24 = vld [vmem:[#allocation6 + $0x80] ss:$8 sps:$4 sm:$0xff]   ;;  %v1368_v26 = vld [vmem:[#allocation6 + $0x94] ss:$8 sps:$4 sm:$0xff]   ;;  %v1329_v27 = vld [vmem:[#allocation6 + $0x124] ss:$8 sps:$4 sm:$0xff]  }
  0x44   :  { %v1366_v28 = vld [vmem:[#allocation6 + $0x90] ss:$8 sps:$4 sm:$0xff]   ;;  %v1374_v30 = vld [vmem:[#allocation6 + $0xa4] ss:$8 sps:$4 sm:$0xff]   ;;  %v1327_v31 = vld [vmem:[#allocation6 + $0x120] ss:$8 sps:$4 sm:$0xff]  }
  0x45   :  { %366 = vmatpush1.bf16.msra.mxu0 %v1274_v37  ;;  %407 = vmatpush1.bf16.msra.mxu1 %v1275_v38  ;;  %v1335_v32 = vld [vmem:[#allocation6 + $0x134] ss:$8 sps:$4 sm:$0xff]   ;;  %v1372_v33 = vld [vmem:[#allocation6 + $0xa0] ss:$8 sps:$4 sm:$0xff]   ;;  %v1333_v35 = vld [vmem:[#allocation6 + $0x130] ss:$8 sps:$4 sm:$0xff]  }
  0x46   :  { %367 = vmatprep.subr.bf16.mxu0 %v1276_v40  ;;  %408 = vmatprep.subr.bf16.mxu1 %v1278_v41  ;;  %v1380_v34 = vld [vmem:[#allocation6 + $0xb4] ss:$8 sps:$4 sm:$0xff]   ;;  %v1341_v36 = vld [vmem:[#allocation6 + $0x144] ss:$8 sps:$4 sm:$0xff]   ;;  %v1378_v37 = vld [vmem:[#allocation6 + $0xb0] ss:$8 sps:$4 sm:$0xff]  }
  0x47   :  { %v1386_v38 = vld [vmem:[#allocation6 + $0xc4] ss:$8 sps:$4 sm:$0xff]   ;;  %v1339_v39 = vld [vmem:[#allocation6 + $0x140] ss:$8 sps:$4 sm:$0xff]   ;;  %v1347_v40 = vld [vmem:[#allocation6 + $0x154] ss:$8 sps:$4 sm:$0xff]  }
  0x48   :  { %v1384_v41 = vld [vmem:[#allocation6 + $0xc0] ss:$8 sps:$4 sm:$0xff]   ;;  %v1392_v42 = vld [vmem:[#allocation6 + $0xd4] ss:$8 sps:$4 sm:$0xff]   ;;  %s1085_s22 = sshll.u32 %s1488_s21, 4  ;;  %s1086_s22 = int_to_ptr.vmem [resolvable:$true] %s1085_s22 }
  0x49   :  { %368 = vmatpush1.bf16.msra.mxu0 %v1280_v43  ;;  %409 = vmatpush1.bf16.msra.mxu1 %v1281_v44  ;;  %v1345_v43 = vld [vmem:[#allocation6 + $0x150] ss:$8 sps:$4 sm:$0xff]   ;;  %v1353_v44 = vld [vmem:[#allocation6 + $0x164] ss:$8 sps:$4 sm:$0xff]   ;;  %p1457_p3 = scmp.lt.s32.totalorder %s1086_s22, %s1086_s22 }
  0x4a   :  { %369 = vmatprep.subr.bf16.mxu0 %v1282_v45  ;;  %410 = vmatprep.subr.bf16.mxu1 %v1284_v46  ;;  %v1390_v45 = vld [vmem:[#allocation6 + $0xd0] ss:$8 sps:$4 sm:$0xff]   ;;  %v1351_v46 = vld [vmem:[#allocation6 + $0x160] ss:$8 sps:$4 sm:$0xff]  }
  0x4d   :  { %370 = vmatpush1.bf16.msra.mxu0 %v1286_v47  ;;  %411 = vmatpush1.bf16.msra.mxu1 %v1287_v48  ;;  %v1359_v47 = vld [vmem:[#allocation6 + $0x174] ss:$8 sps:$4 sm:$0xff]   ;;  %v1357_v48 = vld [vmem:[#allocation6 + $0x170] ss:$8 sps:$4 sm:$0xff]  }
  0x4e   :  { %608 = vmatprep.subr.bf16.mxu0 %v1290_v49  ;;  %969 = vmatprep.subr.bf16.mxu1 %v1314_v51  ;;  %v1365_v49 = vld [vmem:[#allocation6 + $0x184] ss:$8 sps:$4 sm:$0xff]   ;;  %v1371_v51 = vld [vmem:[#allocation6 + $0x194] ss:$8 sps:$4 sm:$0xff]  }
  0x50   :  { %384 = vmatmul.mubr.bf16.vlgmr.msra.gmra.mrb[0].mxu0 %v138_v50  ;;  %425 = vmatmul.mubr.bf16.vlgmr.msra.gmra.mrb[0].mxu1 %v138_v50  ;;  %v1363_v50 = vld [vmem:[#allocation6 + $0x180] ss:$8 sps:$4 sm:$0xff]  }
  0x51   :  { %609 = vmatpush1.bf16.msra.mxu0 %v1288_v52  ;;  %640 = vmatprep.mubr.bf16.mxu0 %v1487_v57  ;;  %v1369_v52 = vld [vmem:[#allocation6 + $0x190] ss:$8 sps:$4 sm:$0xff]   ;;  %v1389_v57 = vld [vmem:[#allocation6 + $0x1c4] ss:$8 sps:$4 sm:$0xff]  }
  0x52   :  { %610 = vmatprep.subr.bf16.mxu0 %v1293_v53  ;;  %970 = vmatpush1.bf16.msra.mxu1 %v1312_v54  ;;  %v1377_v53 = vld [vmem:[#allocation6 + $0x1a4] ss:$8 sps:$4 sm:$0xff]   ;;  %v1375_v54 = vld [vmem:[#allocation6 + $0x1a0] ss:$8 sps:$4 sm:$0xff]  }
  0x53   :  { %971 = vmatprep.subr.bf16.mxu1 %v1320_v55  ;;  %v1383_v55 = vld [vmem:[#allocation6 + $0x1b4] ss:$8 sps:$4 sm:$0xff]  }
  0x55   :  { %611 = vmatpush1.bf16.msra.mxu0 %v1291_v56  ;;  %v1381_v56 = vld [vmem:[#allocation6 + $0x1b0] ss:$8 sps:$4 sm:$0xff]  }
  0x56   :  { %612 = vmatprep.subr.bf16.mxu0 %v1296_v58  ;;  %972 = vmatpush1.bf16.msra.mxu1 %v1318_v59  ;;  %v1387_v58 = vld [vmem:[#allocation6 + $0x1c0] ss:$8 sps:$4 sm:$0xff]   ;;  %v1395_v59 = vld [vmem:[#allocation6 + $0x1d4] ss:$8 sps:$4 sm:$0xff]  }
  0x57   :  { %973 = vmatprep.subr.bf16.mxu1 %v1326_v60  ;;  %v1393_v60 = vld [vmem:[#allocation6 + $0x1d0] ss:$8 sps:$4 sm:$0xff]  }
  0x59   :  { %613 = vmatpush1.bf16.msra.mxu0 %v1294_v61  ;;  %v1398_v61 = vld [vmem:[#allocation6 + $0xe4] ss:$8 sps:$4 sm:$0xff]  }
  0x5a   :  { %614 = vmatprep.subr.bf16.mxu0 %v1299_v62  ;;  %974 = vmatpush1.bf16.msra.mxu1 %v1324_v63  ;;  %v1401_v62 = vld [vmem:[#allocation6 + $0x1e4] ss:$8 sps:$4 sm:$0xff]   ;;  %v1396_v63 = vld [vmem:[#allocation6 + $0xe0] ss:$8 sps:$4 sm:$0xff]  }
  0x5b   :  { %975 = vmatprep.subr.bf16.mxu1 %v1332_v0  ;;  %v1399_v0 = vld [vmem:[#allocation6 + $0x1e0] ss:$8 sps:$4 sm:$0xff]  }
  0x5d   :  { %615 = vmatpush1.bf16.msra.mxu0 %v1297_v1  ;;  %v1404_v1 = vld [vmem:[#allocation6 + $0xf4] ss:$8 sps:$4 sm:$0xff]  }
  0x5e   :  { %616 = vmatprep.subr.bf16.mxu0 %v1302_v2  ;;  %976 = vmatpush1.bf16.msra.mxu1 %v1330_v3  ;;  %v1407_v2 = vld [vmem:[#allocation6 + $0x1f4] ss:$8 sps:$4 sm:$0xff]   ;;  %v1402_v3 = vld [vmem:[#allocation6 + $0xf0] ss:$8 sps:$4 sm:$0xff]  }
  0x5f   :  { %977 = vmatprep.subr.bf16.mxu1 %v1338_v4  ;;  %v1405_v4 = vld [vmem:[#allocation6 + $0x1f0] ss:$8 sps:$4 sm:$0xff]  }
  0x61   :  { %617 = vmatpush1.bf16.msra.mxu0 %v1300_v5  ;;  %v105_v5 = vsub.s32 0, %v1558_v29 }
  0x62   :  { %618 = vmatprep.subr.bf16.mxu0 %v1305_v6  ;;  %978 = vmatpush1.bf16.msra.mxu1 %v1336_v7  ;;  %v113_v6 = vsub.s32 2, %v1558_v29  ;;  %v101_v7 = vld [vmem:[%s1644_s4] sm:$0xf] }
  0x63   :  { %979 = vmatprep.subr.bf16.mxu1 %v1344_v8  ;;  %v109_v8 = vsub.s32 1, %v1558_v29 }
  0x65   :  { %619 = vmatpush1.bf16.msra.mxu0 %v1303_v9  ;;  %v117_v9 = vsub.s32 3, %v1558_v29 }
  0x66   :  { %620 = vmatprep.subr.bf16.mxu0 %v1308_v10  ;;  %980 = vmatpush1.bf16.msra.mxu1 %v1342_v11  ;;  %v106_v10 = vrot.slane %v101_v7, %v105_v5  ;;  %v114_v11 = vrot.slane %v101_v7, %v113_v6 }
  0x67   :  { %981 = vmatprep.subr.bf16.mxu1 %v1350_v12  ;;  %v110_v12 = vrot.slane %v101_v7, %v109_v8 }
  0x69   :  { %621 = vmatpush1.bf16.msra.mxu0 %v1306_v13  ;;  %v118_v13 = vrot.slane %v101_v7, %v117_v9 }
  0x6a   :  { %622 = vmatprep.subr.bf16.mxu0 %v1311_v14  ;;  %982 = vmatpush1.bf16.msra.mxu1 %v1348_v15 }
  0x6b   :  { %983 = vmatprep.subr.bf16.mxu1 %v1356_v16 }
  0x6d   :  { %623 = vmatpush1.bf16.msra.mxu0 %v1309_v17 }
  0x6e   :  { %1010 = vmatprep.subr.bf16.mxu0 %v1317_v18  ;;  %984 = vmatpush1.bf16.msra.mxu1 %v1354_v19 }
  0x6f   :  { %985 = vmatprep.subr.bf16.mxu1 %v1362_v20  ;;  %v438_v20 = vstv %s1640_s0 }
  0x70   :  { %641 = vmatmul.mubr.bf16.vlgmr.msra.gmra.mrb[4].mxu0 %v511_v21 }
  0x71   :  { %1011 = vmatpush1.bf16.msra.mxu0 %v1315_v22 }
  0x72   :  { %1012 = vmatprep.subr.bf16.mxu0 %v1323_v23  ;;  %986 = vmatpush1.bf16.msra.mxu1 %v1360_v24 }
  0x73   :  { %987 = vmatprep.subr.bf16.mxu1 %v1368_v26 }
  0x75   :  { %1013 = vmatpush1.bf16.msra.mxu0 %v1321_v25 }
  0x76   :  { %1014 = vmatprep.subr.bf16.mxu0 %v1329_v27  ;;  %988 = vmatpush1.bf16.msra.mxu1 %v1366_v28 }
  0x77   :  { %989 = vmatprep.subr.bf16.mxu1 %v1374_v30 }
  0x79   :  { %1015 = vmatpush1.bf16.msra.mxu0 %v1327_v31 }
  0x7a   :  { %1016 = vmatprep.subr.bf16.mxu0 %v1335_v32  ;;  %990 = vmatpush1.bf16.msra.mxu1 %v1372_v33 }
  0x7b   :  { %991 = vmatprep.subr.bf16.mxu1 %v1380_v34 }
  0x7d   :  { %1017 = vmatpush1.bf16.msra.mxu0 %v1333_v35 }
  0x7e   :  { %1018 = vmatprep.subr.bf16.mxu0 %v1341_v36  ;;  %992 = vmatpush1.bf16.msra.mxu1 %v1378_v37 }
  0x7f   :  { %993 = vmatprep.subr.bf16.mxu1 %v1386_v38 }
  0x81   :  { %1019 = vmatpush1.bf16.msra.mxu0 %v1339_v39 }
  0x82   :  { %1020 = vmatprep.subr.bf16.mxu0 %v1347_v40  ;;  %994 = vmatpush1.bf16.msra.mxu1 %v1384_v41 }
  0x83   :  { %995 = vmatprep.subr.bf16.mxu1 %v1392_v42 }
  0x85   :  { %1021 = vmatpush1.bf16.msra.mxu0 %v1345_v43  ;;  %v1051_v43 = vld [vmem:[%s1647_s7] sm:$0x3]  ;;  %s1452_s7 = scalar_lea.vmem %s1086_s22, 64 }
  0x86   :  { %1022 = vmatprep.subr.bf16.mxu0 %v1353_v44  ;;  %996 = vmatpush1.bf16.msra.mxu1 %v1390_v45  ;;  %p1453_p2 = scmp.ne.s32.totalorder %s1086_s22, %s1452_s7  ;;  %p1458_p4 = scmp.lt.s32.totalorder %s1452_s7, %s1452_s7 }
  0x87   :  { %997 = vmatprep.subr.bf16.mxu1 %v1398_v61 }
  0x88   :  { %p1459_p5 = por %p1458_p4, %p1457_p3 }
  0x89   :  { %1023 = vmatpush1.bf16.msra.mxu0 %v1351_v46 }
  0x8a   :  { %1024 = vmatprep.subr.bf16.mxu0 %v1359_v47  ;;  %998 = vmatpush1.bf16.msra.mxu1 %v1396_v63  ;;  %v1056_v47 = vrot.slane %v1051_v43, %v105_v5  ;;  %p1460_p6 = pnand %p1459_p5, %p1453_p2 }
  0x8b   :  { %999 = vmatprep.subr.bf16.mxu1 %v1404_v1 }
  0x8d   :  { %1025 = vmatpush1.bf16.msra.mxu0 %v1357_v48 }
  0x8e   :  { %1026 = vmatprep.subr.bf16.mxu0 %v1365_v49  ;;  %1000 = vmatpush1.bf16.msra.mxu1 %v1402_v3 }
  0x91   :  { %1027 = vmatpush1.bf16.msra.mxu0 %v1363_v50 }
  0x92   :  { %1028 = vmatprep.subr.bf16.mxu0 %v1371_v51  ;;  %v1060_v51 = vrot.slane %v1051_v43, %v109_v8 }
  0x95   :  { %1029 = vmatpush1.bf16.msra.mxu0 %v1369_v52 }
  0x96   :  { %1030 = vmatprep.subr.bf16.mxu0 %v1377_v53 }
  0x99   :  { %1031 = vmatpush1.bf16.msra.mxu0 %v1375_v54 }
  0x9a   :  { %1032 = vmatprep.subr.bf16.mxu0 %v1383_v55 }
  0x9d   :  { %1033 = vmatpush1.bf16.msra.mxu0 %v1381_v56 }
  0x9e   :  { %1034 = vmatprep.subr.bf16.mxu0 %v1389_v57 }
  0xa1   :  { %1035 = vmatpush1.bf16.msra.mxu0 %v1387_v58 }
  0xa2   :  { %1036 = vmatprep.subr.bf16.mxu0 %v1395_v59 }
  0xa5   :  { %1037 = vmatpush1.bf16.msra.mxu0 %v1393_v60 }
  0xa6   :  { %1038 = vmatprep.subr.bf16.mxu0 %v1401_v62 }
  0xa9   :  { %1039 = vmatpush1.bf16.msra.mxu0 %v1399_v0 }
  0xaa   :  { %1040 = vmatprep.subr.bf16.mxu0 %v1407_v2 }
  0xad   :  { %1041 = vmatpush1.bf16.msra.mxu0 %v1405_v4 }
 0x123   :  { %v385_v14 = vpop.f32.mrb[0].mxu0  ;;  %v426_v15 = vpop.f32.mrb[0].mxu1 }
 0x124   :  { %v386_v16 = vadd.f32 %v385_v14, %v106_v10  ;;  %v427_v17 = vadd.f32 %v426_v15, %v114_v11  ;;  %v387_v18 = vpop.f32.mrb[1].mxu0  ;;  %v428_v19 = vpop.f32.mrb[1].mxu1 }
 0x125   :  { %v388_v21 = vadd.f32 %v387_v18, %v110_v12  ;;  %v429_v22 = vadd.f32 %v428_v19, %v118_v13  ;;  %v389_v23 = vpop.f32.mrb[2].mxu0  ;;  %v430_v24 = vpop.f32.mrb[2].mxu1 }
 0x126   :  { %v433_v25 = vmax.f32 %v386_v16, 0.0  ;;  %v435_v29 = vmax.f32 %v427_v17, 0.0  ;;  %v390_v26 = vpop.f32.mrb[3].mxu0  ;;  %v431_v27 = vpop.f32.mrb[3].mxu1 }
 0x127   :  { %v434_v28 = vmax.f32 %v388_v21, 0.0  ;;  %v436_v30 = vmax.f32 %v429_v22, 0.0 }
 0x128   :  { %v439_v31 = vmul.f32 %v438_v20, %v433_v25  ;;  %v441_v32 = vmul.f32 %v438_v20, %v435_v29 }
 0x129   :  { %v440_v33 = vmul.f32 %v438_v20, %v434_v28  ;;  %v442_v34 = vmul.f32 %v438_v20, %v436_v30 }
 0x12a   :  { %v445_v35 = vpack.c.bf16 %v441_v32, %v441_v32  ;;  %v443_v38 = vpack.c.bf16 %v439_v31, %v439_v31 }
 0x12b   :  { %v444_v36 = vpack.c.bf16 %v440_v33, %v440_v33  ;;  %v446_v37 = vpack.c.bf16 %v442_v34, %v442_v34 }
 0x12d   :  { %1001 = vmatprep.mubr.bf16.mxu1 %v444_v36  ;;  %1042 = vmatprep.mubr.bf16.mxu0 %v446_v37 }
 0x12e   :  { %1002 = vmatmul.mubr.bf16.vlgmr.msra.gmra.mrb[4].mxu1 %v443_v38  ;;  %1043 = vmatmul.mubr.bf16.vlgmr.msra.gmra.mrb[8].mxu0 %v445_v35 }
 0x143   :  { %v642_v39 = vpop.f32.mrb[4].mxu0 }
 0x144   :  { %v644_v40 = vpop.f32.mrb[5].mxu0 }
 0x145   :  { %v646_v41 = vpop.f32.mrb[6].mxu0 }
 0x146   :  { %v647_v42 = vpop.f32.mrb[7].mxu0 }
 0x201   :  { %v1003_v44 = vpop.f32.mrb[4].mxu1  ;;  %v1044_v45 = vpop.f32.mrb[8].mxu0 }
 0x202   :  { %v1004_v46 = vadd.f32 %v1003_v44, %v642_v39  ;;  %v1005_v48 = vpop.f32.mrb[5].mxu1  ;;  %v1046_v49 = vpop.f32.mrb[9].mxu0 }
 0x203   :  { %v1006_v50 = vadd.f32 %v1005_v48, %v644_v40  ;;  %v1007_v52 = vpop.f32.mrb[6].mxu1  ;;  %v1048_v53 = vpop.f32.mrb[10].mxu0 }
 0x204   :  { %v1045_v54 = vadd.f32 %v1044_v45, %v1004_v46  ;;  %v1008_v55 = vpop.f32.mrb[7].mxu1  ;;  %v1049_v56 = vpop.f32.mrb[11].mxu0 }
 0x205   :  { %v1047_v57 = vadd.f32 %v1046_v49, %v1006_v50 }
 0x206   :  { %v1063_v58 = vadd.f32 %v1056_v47, %v1045_v54 }
 0x207   :  { %v1064_v59 = vadd.f32 %v1060_v51, %v1047_v57 }
 0x208   :  { %v1065_v60 = vmax.f32 %v1063_v58, 0.0 }
 0x209   :  { %v1066_v61 = vmax.f32 %v1064_v59, 0.0 }
 0x20b   :  { %v1069_v62 = vcombine.low %v1065_v60, %v1066_v61 }
 0x20d   :  { %1218 = vst.sshfl [vmem:[#allocation8] sm:$0x33 pattern:$0x76325410] %v1069_v62 }
 0x20e   :  { %1463 = shalt.err (!%p1460_p6)
}
 0x20f   :  { %s1464_s25 = scalar_lea.hbm %s1648_s8, 64 }
 0x210   :  { %p1465_p7 = scmp.ne.s32.totalorder %s1648_s8, %s1464_s25  ;;  %p1468_p8 = scmp.lt.u32.totalorder %s1464_s25, %s1648_s8 }
 0x212   :  { %p1470_p9 = pnand %p1468_p8, %p1465_p7 }
 0x214   :  { %1473 = shalt.err (!%p1470_p9)
}
 0x215   :  { %1088 = dma.vmem_to_hbm [thread:$0]  %s1086_s22, 64, %s1648_s8, [#allocation5]  }
 0x216   :  { %1478 = dma.done.wait [#allocation5], 64  }
 0x217   :  { %1479 = vsyncadd [#allocation5], 4294967232 }
 0x218   :  { %1092 = vsyncpa [#allocation4], 1 }
 0x219   :  { %1093 = vsyncpa [#allocation7], 1 }
 0x21a   :  { %1094 = vsyncpa [#allocation5], 1 }

</bundles_post_ra>
